<compile_context>
chip_gen: v5e
topology: v5e:2x2
jax: 0.10.0
libtpu: 0.0.40
codegen_flags: <defaults>
</compile_context>

<pallas_src>
import jax
import jax.numpy as jnp
from jax.experimental import pallas as pl
from jax.experimental.pallas import tpu as pltpu


def _round_up(v, m):
    return ((v + m - 1) // m) * m


def make_kernel(n, n_a, g_pad, width):
    """Build the kernel with static slab offsets closed over."""

    def kernel(graph_ref, data_ref, wts_ref, par_ref, o_ref):
        a = graph_ref[0:n, :]                      # [n, n]      bf16 A_hat
        member = graph_ref[n_a:n_a + g_pad, :]     # [g_pad, n]  bf16 0/1 membership

        x = data_ref[0:n, 0:1]                     # [n, 1]      f32 node features
        inv_cnt = data_ref[0:g_pad, 1:2]           # [g_pad, 1]  f32 1/|graph|

        w1 = par_ref[0:1, :]                       # [1, W] f32 (lanes >= H are zero)
        b1 = par_ref[1:2, :]
        b2 = par_ref[2:3, :]
        bf1 = par_ref[3:4, :]
        bf2 = par_ref[4:5, :]

        w2 = wts_ref[0:width, :]                   # [W, W] bf16, real block [0:H, 0:H]
        wf1 = wts_ref[width:2 * width, :]          # real block [0:H, 0:FC]
        wf2 = wts_ref[2 * width:3 * width, :]      # real block [0:FC, 0:C]

        # ---- GCN layer 1: relu(A_hat @ (x @ W1) + b1) ----
        # K=1 contraction -> VPU broadcast multiply, no MXU push for this step.
        xw = x * w1                                # f32 [n, W]
        h1 = jnp.dot(a, xw.astype(jnp.bfloat16),
                     preferred_element_type=jnp.float32)
        h1 = jnp.maximum(h1 + b1, 0.0)
        # dropout(p=0.2) in eval mode -> identity

        # ---- GCN layer 2: relu(A_hat @ (h1 @ W2) + b2) ----
        hw = jnp.dot(h1.astype(jnp.bfloat16), w2,
                     preferred_element_type=jnp.float32)
        h2 = jnp.dot(a, hw.astype(jnp.bfloat16),
                     preferred_element_type=jnp.float32)
        h2 = jnp.maximum(h2 + b2, 0.0)

        # ---- global mean pool: exact 0/1 membership matmul + f32 1/count ----
        p = jnp.dot(member, h2.astype(jnp.bfloat16),
                    preferred_element_type=jnp.float32)
        p = p * inv_cnt

        # ---- fc1 + ReLU (dropout -> identity) ----
        z = jnp.dot(p.astype(jnp.bfloat16), wf1,
                    preferred_element_type=jnp.float32)
        z = jnp.maximum(z + bf1, 0.0)

        # ---- fc2: lane-dense [g_pad, 128] store; padded lanes are exact zeros ----
        o_ref[...] = jnp.dot(z.astype(jnp.bfloat16), wf2,
                             preferred_element_type=jnp.float32) + bf2

    return kernel


def pack_weights(w1, b1, w2, b2, wf1, bf1, wf2, bf2, width=128):
    """Pack all static parameters into one bf16 slab + one f32 slab.

    Call once; in a training/serving loop these are closed-over constants.
    """
    h = w2.shape[0]
    fc = wf1.shape[1]
    c = wf2.shape[1]
    assert max(h, fc, c) <= width

    params = jnp.zeros((8, width), jnp.float32)
    params = params.at[0, :h].set(w1.reshape(-1))
    params = params.at[1, :h].set(b1.reshape(-1))
    params = params.at[2, :h].set(b2.reshape(-1))
    params = params.at[3, :fc].set(bf1.reshape(-1))
    params = params.at[4, :c].set(bf2.reshape(-1))

    wts = jnp.zeros((3 * width, width), jnp.float32)
    wts = wts.at[0:h, 0:h].set(w2)
    wts = wts.at[width:width + h, 0:fc].set(wf1)
    wts = wts.at[2 * width:2 * width + fc, 0:c].set(wf2)
    return wts.astype(jnp.bfloat16), params


def pack_graph(a_hat, onehot, inv_counts, x):
    """Pack per-batch graph data: one bf16 slab (A_hat + membership) + one f32 slab."""
    n = a_hat.shape[0]
    g = onehot.shape[0]
    g_pad = _round_up(g, 8)
    n_a = _round_up(n, 16)          # bf16 sublane-tile aligned row offset
    g_rows = _round_up(g_pad, 16)

    graph = jnp.zeros((n_a + g_rows, n), jnp.float32)
    graph = graph.at[0:n, :].set(a_hat)
    graph = graph.at[n_a:n_a + g, :].set(onehot)

    aux_rows = _round_up(max(n, g_pad), 8)
    data = jnp.zeros((aux_rows, 2), jnp.float32)
    data = data.at[0:n, 0].set(x.reshape(-1))
    data = data.at[0:g, 1].set(inv_counts)

    return graph.astype(jnp.bfloat16), data, g_pad, n_a


def enzyme_forward(graph_bf, data_f32, wts_bf, params_f32, *,
                   n_nodes, n_a, g_pad, num_graphs, num_classes, width=128):
    """Full forward pass in one Pallas call; returns [num_graphs, C] logits."""
    kernel = make_kernel(n=n_nodes, n_a=n_a, g_pad=g_pad, width=width)
    vmem = pl.BlockSpec(memory_space=pltpu.MemorySpace.VMEM)

    flops = 2 * (n_nodes * n_nodes * width      # A_hat @ xw
                 + n_nodes * width * width      # h1 @ W2
                 + n_nodes * n_nodes * width    # A_hat @ hw
                 + g_pad * n_nodes * width      # member @ h2
                 + g_pad * width * width        # p @ Wf1
                 + g_pad * width * width)       # z @ Wf2
    bytes_accessed = (graph_bf.size * 2 + data_f32.size * 4
                      + wts_bf.size * 2 + params_f32.size * 4
                      + g_pad * width * 4)

    out = pl.pallas_call(
        kernel,
        out_shape=jax.ShapeDtypeStruct((g_pad, width), jnp.float32),
        in_specs=[vmem, vmem, vmem, vmem],
        out_specs=vmem,
        cost_estimate=pl.CostEstimate(flops=int(flops), transcendentals=0,
                                      bytes_accessed=int(bytes_accessed)),
    )(graph_bf, data_f32, wts_bf, params_f32)
    # Padded rows (g >= num_graphs) hold bias-derived garbage; padded lanes are 0.
    return out[:num_graphs, :num_classes]


def build_normalized_adjacency(edge_index, num_nodes):
    """A_hat = D^{-1/2} (A + I) D^{-1/2}, matching PyG GCNConv defaults.

    Self loops are set (not added), matching add_remaining_self_loops even if
    edge_index already contains self loops.
    """
    src, dst = edge_index[0], edge_index[1]
    a = jnp.zeros((num_nodes, num_nodes), dtype=jnp.float32)
    a = a.at[dst, src].set(1.0)                     # message j -> i lands in A[i, j]
    idx = jnp.arange(num_nodes)
    a = a.at[idx, idx].set(1.0)                     # remaining self loops
    deg = jnp.sum(a, axis=1)
    dinv = jnp.where(deg > 0, 1.0 / jnp.sqrt(deg), 0.0)
    return dinv[:, None] * a * dinv[None, :]


def build_membership(batch, num_graphs):
    """Returns exact 0/1 membership [G, N] and f32 1/count per graph [G]."""
    onehot = (batch[None, :] == jnp.arange(num_graphs)[:, None]).astype(jnp.float32)
    counts = jnp.maximum(onehot.sum(axis=1), 1.0)
    return onehot, 1.0 / counts


if __name__ == "__main__":
    key = jax.random.PRNGKey(0)

    # Small synthetic enzyme-graph batch: 2 graphs, 16 nodes each.
    N = 32            # total nodes
    G = 2             # graphs in batch
    HIDDEN = 64
    FC_HIDDEN = 32
    NUM_CLASSES = 7   # EC top-level classes 1..7
    F_IN = 1          # data.x is 1-D node feature -> unsqueezed to [N, 1]
    WIDTH = 128       # lane width of the padded pipeline

    k0, k1, k2, k3, k4, k5, k6 = jax.random.split(key, 7)
    x = jax.random.normal(k0, (N, F_IN), dtype=jnp.float32)

    # Ring graph within each half, both edge directions (undirected).
    half = N // G
    edges = []
    for g in range(G):
        base = g * half
        for i in range(half):
            a_node = base + i
            b_node = base + (i + 1) % half
            edges.append((a_node, b_node))
            edges.append((b_node, a_node))
    edge_index = jnp.array(edges, dtype=jnp.int32).T  # [2, E]

    batch = jnp.concatenate(
        [jnp.full((half,), g, dtype=jnp.int32) for g in range(G)])

    a_hat = build_normalized_adjacency(edge_index, N)
    onehot, inv_counts = build_membership(batch, G)

    # Deterministic parameter init (Glorot-ish scaling, like GCNConv/Linear).
    def glorot(k, shape):
        fan_in, fan_out = shape[0], shape[1]
        limit = jnp.sqrt(6.0 / (fan_in + fan_out))
        return jax.random.uniform(k, shape, jnp.float32, -limit, limit)

    w1 = glorot(k1, (F_IN, HIDDEN))
    b1 = jnp.zeros((1, HIDDEN), dtype=jnp.float32)
    w2 = glorot(k2, (HIDDEN, HIDDEN))
    b2 = jnp.zeros((1, HIDDEN), dtype=jnp.float32)
    wf1 = glorot(k3, (HIDDEN, FC_HIDDEN))
    bf1 = jax.random.uniform(k4, (1, FC_HIDDEN), jnp.float32, -0.1, 0.1)
    wf2 = glorot(k5, (FC_HIDDEN, NUM_CLASSES))
    bf2 = jax.random.uniform(k6, (1, NUM_CLASSES), jnp.float32, -0.1, 0.1)

    # Hoisted packing: weights once, graph data once per batch.
    wts_bf, params_f32 = pack_weights(w1, b1, w2, b2, wf1, bf1, wf2, bf2, WIDTH)
    graph_bf, data_f32, g_pad, n_a = pack_graph(a_hat, onehot, inv_counts, x)

    out = enzyme_forward(graph_bf, data_f32, wts_bf, params_f32,
                         n_nodes=N, n_a=n_a, g_pad=g_pad,
                         num_graphs=G, num_classes=NUM_CLASSES, width=WIDTH)
    out = jax.block_until_ready(out)

    # Pure-JAX reference of the same math with identical bf16-in / f32-acc
    # matmul precision and the same rounding points, so the comparison is tight.
    def ref_forward():
        a = a_hat.astype(jnp.bfloat16)
        xw = x * w1
        h1 = jnp.maximum(
            jnp.dot(a, xw.astype(jnp.bfloat16), preferred_element_type=jnp.float32) + b1, 0.0)
        hw = jnp.dot(h1.astype(jnp.bfloat16), w2.astype(jnp.bfloat16),
                     preferred_element_type=jnp.float32)
        h2 = jnp.maximum(
            jnp.dot(a, hw.astype(jnp.bfloat16), preferred_element_type=jnp.float32) + b2, 0.0)
        p = jnp.dot(onehot.astype(jnp.bfloat16), h2.astype(jnp.bfloat16),
                    preferred_element_type=jnp.float32) * inv_counts[:, None]
        z = jnp.maximum(
            jnp.dot(p.astype(jnp.bfloat16), wf1.astype(jnp.bfloat16),
                    preferred_element_type=jnp.float32) + bf1, 0.0)
        return jnp.dot(z.astype(jnp.bfloat16), wf2.astype(jnp.bfloat16),
                       preferred_element_type=jnp.float32) + bf2

    ref = jax.block_until_ready(ref_forward())
    assert out.shape == (G, NUM_CLASSES)
    assert jnp.allclose(out, ref, atol=1e-3, rtol=1e-3)

    print("KERNEL_OK")
</pallas_src>

<mosaic_0001>
module attributes {stable_mosaic.version = 11 : i64} {
  func.func @kernel(%arg0: memref<48x32xbf16, #tpu.memory_space<vmem>>, %arg1: memref<32x2xf32, #tpu.memory_space<vmem>>, %arg2: memref<384x128xbf16, #tpu.memory_space<vmem>>, %arg3: memref<8x128xf32, #tpu.memory_space<vmem>>, %arg4: memref<8x128xf32, #tpu.memory_space<vmem>>) attributes {dimension_semantics = [], scalar_prefetch = 0 : i64, scratch_operands = 0 : i64, tpu.core_type = #tpu.core_type<tc>} {
    %c0 = arith.constant 0 : index
    %c0_0 = arith.constant 0 : index
    %0 = vector.load %arg0[%c0, %c0_0] : memref<48x32xbf16, #tpu.memory_space<vmem>>, vector<32x32xbf16>
    %c32 = arith.constant 32 : index
    %c0_1 = arith.constant 0 : index
    %1 = vector.load %arg0[%c32, %c0_1] : memref<48x32xbf16, #tpu.memory_space<vmem>>, vector<8x32xbf16>
    %c0_2 = arith.constant 0 : index
    %c0_3 = arith.constant 0 : index
    %2 = vector.load %arg1[%c0_2, %c0_3] : memref<32x2xf32, #tpu.memory_space<vmem>>, vector<32x1xf32>
    %c0_4 = arith.constant 0 : index
    %c1 = arith.constant 1 : index
    %3 = vector.load %arg1[%c0_4, %c1] : memref<32x2xf32, #tpu.memory_space<vmem>>, vector<8x1xf32>
    %c0_5 = arith.constant 0 : index
    %c0_6 = arith.constant 0 : index
    %4 = vector.load %arg3[%c0_5, %c0_6] : memref<8x128xf32, #tpu.memory_space<vmem>>, vector<1x128xf32>
    %c1_7 = arith.constant 1 : index
    %c0_8 = arith.constant 0 : index
    %5 = vector.load %arg3[%c1_7, %c0_8] : memref<8x128xf32, #tpu.memory_space<vmem>>, vector<1x128xf32>
    %c2 = arith.constant 2 : index
    %c0_9 = arith.constant 0 : index
    %6 = vector.load %arg3[%c2, %c0_9] : memref<8x128xf32, #tpu.memory_space<vmem>>, vector<1x128xf32>
    %c3 = arith.constant 3 : index
    %c0_10 = arith.constant 0 : index
    %7 = vector.load %arg3[%c3, %c0_10] : memref<8x128xf32, #tpu.memory_space<vmem>>, vector<1x128xf32>
    %c4 = arith.constant 4 : index
    %c0_11 = arith.constant 0 : index
    %8 = vector.load %arg3[%c4, %c0_11] : memref<8x128xf32, #tpu.memory_space<vmem>>, vector<1x128xf32>
    %c0_12 = arith.constant 0 : index
    %c0_13 = arith.constant 0 : index
    %9 = vector.load %arg2[%c0_12, %c0_13] : memref<384x128xbf16, #tpu.memory_space<vmem>>, vector<128x128xbf16>
    %c128 = arith.constant 128 : index
    %c0_14 = arith.constant 0 : index
    %10 = vector.load %arg2[%c128, %c0_14] : memref<384x128xbf16, #tpu.memory_space<vmem>>, vector<128x128xbf16>
    %c256 = arith.constant 256 : index
    %c0_15 = arith.constant 0 : index
    %11 = vector.load %arg2[%c256, %c0_15] : memref<384x128xbf16, #tpu.memory_space<vmem>>, vector<128x128xbf16>
    %12 = vector.broadcast %2 : vector<32x1xf32> to vector<32x128xf32>
    %13 = vector.broadcast %4 : vector<1x128xf32> to vector<32x128xf32>
    %14 = arith.mulf %12, %13 : vector<32x128xf32>
    %15 = arith.truncf %14 : vector<32x128xf32> to vector<32x128xbf16>
    %cst = arith.constant dense<0.000000e+00> : vector<32x128xf32>
    %16 = tpu.matmul %0, %15, %cst {dimension_numbers = #tpu.dot_dimension_numbers<[1], [0], [0], [1], [0, 0, 1, 1], [], []>} : vector<32x32xbf16>, vector<32x128xbf16>, vector<32x128xf32> -> vector<32x128xf32>
    %17 = vector.broadcast %5 : vector<1x128xf32> to vector<32x128xf32>
    %18 = arith.addf %16, %17 : vector<32x128xf32>
    %cst_16 = arith.constant 0.000000e+00 : f32
    %19 = vector.broadcast %cst_16 : f32 to vector<32x128xf32>
    %20 = arith.maximumf %18, %19 : vector<32x128xf32>
    %21 = arith.truncf %20 : vector<32x128xf32> to vector<32x128xbf16>
    %cst_17 = arith.constant dense<0.000000e+00> : vector<32x128xf32>
    %22 = tpu.matmul %21, %9, %cst_17 {dimension_numbers = #tpu.dot_dimension_numbers<[1], [0], [0], [1], [0, 0, 1, 1], [], []>} : vector<32x128xbf16>, vector<128x128xbf16>, vector<32x128xf32> -> vector<32x128xf32>
    %23 = arith.truncf %22 : vector<32x128xf32> to vector<32x128xbf16>
    %cst_18 = arith.constant dense<0.000000e+00> : vector<32x128xf32>
    %24 = tpu.matmul %0, %23, %cst_18 {dimension_numbers = #tpu.dot_dimension_numbers<[1], [0], [0], [1], [0, 0, 1, 1], [], []>} : vector<32x32xbf16>, vector<32x128xbf16>, vector<32x128xf32> -> vector<32x128xf32>
    %25 = vector.broadcast %6 : vector<1x128xf32> to vector<32x128xf32>
    %26 = arith.addf %24, %25 : vector<32x128xf32>
    %cst_19 = arith.constant 0.000000e+00 : f32
    %27 = vector.broadcast %cst_19 : f32 to vector<32x128xf32>
    %28 = arith.maximumf %26, %27 : vector<32x128xf32>
    %29 = arith.truncf %28 : vector<32x128xf32> to vector<32x128xbf16>
    %cst_20 = arith.constant dense<0.000000e+00> : vector<8x128xf32>
    %30 = tpu.matmul %1, %29, %cst_20 {dimension_numbers = #tpu.dot_dimension_numbers<[1], [0], [0], [1], [0, 0, 1, 1], [], []>} : vector<8x32xbf16>, vector<32x128xbf16>, vector<8x128xf32> -> vector<8x128xf32>
    %31 = vector.broadcast %3 : vector<8x1xf32> to vector<8x128xf32>
    %32 = arith.mulf %30, %31 : vector<8x128xf32>
    %33 = arith.truncf %32 : vector<8x128xf32> to vector<8x128xbf16>
    %cst_21 = arith.constant dense<0.000000e+00> : vector<8x128xf32>
    %34 = tpu.matmul %33, %10, %cst_21 {dimension_numbers = #tpu.dot_dimension_numbers<[1], [0], [0], [1], [0, 0, 1, 1], [], []>} : vector<8x128xbf16>, vector<128x128xbf16>, vector<8x128xf32> -> vector<8x128xf32>
    %35 = vector.broadcast %7 : vector<1x128xf32> to vector<8x128xf32>
    %36 = arith.addf %34, %35 : vector<8x128xf32>
    %cst_22 = arith.constant 0.000000e+00 : f32
    %37 = vector.broadcast %cst_22 : f32 to vector<8x128xf32>
    %38 = arith.maximumf %36, %37 : vector<8x128xf32>
    %39 = arith.truncf %38 : vector<8x128xf32> to vector<8x128xbf16>
    %cst_23 = arith.constant dense<0.000000e+00> : vector<8x128xf32>
    %40 = tpu.matmul %39, %11, %cst_23 {dimension_numbers = #tpu.dot_dimension_numbers<[1], [0], [0], [1], [0, 0, 1, 1], [], []>} : vector<8x128xbf16>, vector<128x128xbf16>, vector<8x128xf32> -> vector<8x128xf32>
    %41 = vector.broadcast %8 : vector<1x128xf32> to vector<8x128xf32>
    %42 = arith.addf %40, %41 : vector<8x128xf32>
    %c0_24 = arith.constant 0 : index
    %c0_25 = arith.constant 0 : index
    %43 = vector.load %arg4[%c0_24, %c0_25] : memref<8x128xf32, #tpu.memory_space<vmem>>, vector<8x128xf32>
    tpu.vector_store %arg4[%c0_24, %c0_25], %42 {strides = array<i32>} : memref<8x128xf32, #tpu.memory_space<vmem>>, vector<8x128xf32>,
    return
  }
}

</mosaic_0001>

<bundles_post_ra>
// kernel: tpu_custom_call.1
= control target key start
LH: loop header
LB: loop body
LE: loop exit
PB: predicated region body
PF: predicated region fallthrough
CT: control target
= control target key end

     0   :  { %9 = vsyncpa [#allocation3], 0  ;;  %s712_s0 = inlined_call_operand.vmem [shape: bf16[48,32], index: 0, kind: input, shape index: {}]   ;;  %s713_s1 = inlined_call_operand.vmem [shape: f32[32,2], index: 1, kind: input, shape index: {}]   ;;  %s714_s2 = inlined_call_operand.hbm [shape: bf16[384,128], index: 2, kind: input, shape index: {}]   ;;  %s715_s3 = inlined_call_operand.vmem [shape: f32[8,128], index: 3, kind: input, shape index: {}]   ;;  %s716_s4 = inlined_call_operand.hbm [shape: f32[8,128], index: 4, kind: output, shape index: {}]  }
   0x1   :  { %10 = vsyncpa [#allocation4], 0  ;;  %s19_s17 = sshll.u32 %s714_s2, 4  ;;  %s630_s18 = smov [#allocation2]   ;;  %s20_s17 = int_to_ptr.hbm [resolvable:$true] %s19_s17 }
   0x2   :  { %s21_s19 = sshll.u32 %s630_s18, 4  ;;  %s631_s20 = smov 64   ;;  %s22_s19 = int_to_ptr.vmem [resolvable:$true] %s21_s19 }
   0x3   :  { %s632_s21 = smov 4  }
   0x4   :  { %27 = dma.hbm_to_vmem [thread:$0]  %s20_s17, 3072, %s22_s19, [#allocation3], %s631_s20, %s631_s20, %s632_s21  }
   0x5   :  { %626 = dma.done.wait [#allocation3], 3072  }
   0x6   :  { %627 = vsyncadd [#allocation3], 4294964224  ;;  %v633_v0 = vmov 0   ;;  %v42_v1 = vld [vmem:[%s713_s1 + $0x10] sm:$0xff]  ;;  %v670_v2 = vld [vmem:[%s713_s1] sm:$0xff]  ;;  %vm135_vm0 = vcmask 261120  }
   0x7   :  { %570 = vset.pattern.permute.xlu1 %v633_v0  ;;  %569 = vset.pattern.permute.xlu0 %v633_v0  ;;  %v43_v3 = vld [vmem:[%s713_s1 + $0x18] sm:$0xff]  ;;  %v41_v4 = vld [vmem:[%s713_s1 + $0x8] sm:$0xff]  ;;  %v573_v8 = vld [vmem:[%s715_s3] ss:$0 sm:$0xff]  ;;  %v634_v49 = vmov 1   ;;  %s635_s17 = smov [#allocation5]  }
   0x8   :  { %109 = vperm.xlu0 %569, %v42_v1   ;;  %99 = vperm.xlu1 %570, %v670_v2   ;;  %v546_v7 = vld [vmem:[#allocation2 + $0x38] sm:$0xff]  ;;  %v545_v9 = vld [vmem:[#allocation2 + $0x30] sm:$0xff]  ;;  %v544_v14 = vld [vmem:[#allocation2 + $0x28] sm:$0xff]  ;;  %s416_s18 = sshll.u32 %s635_s17, 4  ;;  %s418_s21 = sshll.u32 %s716_s4, 4  ;;  %s417_s18 = int_to_ptr.vmem [resolvable:$true] %s416_s18  ;;  %s419_s21 = int_to_ptr.hbm [resolvable:$true] %s418_s21 }
   0x9   :  { %215 = vmatpush.bf16.msra.mxu1 %v546_v7  ;;  %v543_v18 = vld [vmem:[#allocation2 + $0x20] sm:$0xff]  ;;  %v538_v21 = vld [vmem:[%s712_s0 + $0x8] sm:$0xff]  ;;  %v542_v22 = vld [vmem:[#allocation2 + $0x18] sm:$0xff]  ;;  %571 = vset.pattern.permute.xlu2 %v634_v49 }
   0xa   :  { %v537_v20 = vld [vmem:[%s712_s0] sm:$0xff]  ;;  %v541_v23 = vld [vmem:[#allocation2 + $0x10] sm:$0xff]  ;;  %v540_v24 = vld [vmem:[#allocation2 + $0x8] sm:$0xff]  ;;  %279 = vperm.xlu2 %571, %v670_v2  }
   0xb   :  { %v539_v25 = vld [vmem:[#allocation2] sm:$0xff]  ;;  %v554_v48 = vld [vmem:[#allocation2 + $0x78] sm:$0xff]  ;;  %v553_v51 = vld [vmem:[#allocation2 + $0x70] sm:$0xff] }
   0xc   :  { %v574_v27 = vld [vmem:[%s715_s3 + $0x1] ss:$0 sm:$0xff]  ;;  %v552_v52 = vld [vmem:[#allocation2 + $0x68] sm:$0xff]  ;;  %v550_v55 = vld [vmem:[#allocation2 + $0x58] sm:$0xff] }
   0xd   :  { %216 = vmatpush.bf16.msra.mxu1 %v545_v9  ;;  %v551_v54 = vld [vmem:[#allocation2 + $0x60] sm:$0xff]  ;;  %v549_v59 = vld [vmem:[#allocation2 + $0x50] sm:$0xff]  ;;  %v548_v1 = vld [vmem:[#allocation2 + $0x48] sm:$0xff] }
   0xe   :  { %v575_v56 = vld [vmem:[%s715_s3 + $0x2] ss:$0 sm:$0xff]  ;;  %v561_v9 = vld [vmem:[#allocation2 + $0xb0] sm:$0xff] }
   0xf   :  { %v547_v7 = vld [vmem:[#allocation2 + $0x40] sm:$0xff] }
  0x10   :  { %114 = vperm.xlu0 %569, %v43_v3   ;;  %104 = vperm.xlu1 %570, %v41_v4  }
  0x11   :  { %217 = vmatpush.bf16.msra.mxu1 %v544_v14 }
  0x15   :  { %218 = vmatpush.bf16.msra.mxu1 %v543_v18 }
  0x18   :  { %572 = vset.pattern.permute.xlu0 %v634_v49 }
  0x19   :  { %219 = vmatpush.bf16.msra.mxu1 %v542_v22 }
  0x1d   :  { %220 = vmatpush.bf16.msra.mxu1 %v541_v23 }
  0x21   :  { %221 = vmatpush.bf16.msra.mxu1 %v540_v24 }
  0x25   :  { %222 = vmatpush.bf16.msra.mxu1 %v539_v25 }
  0x64   :  { %v280_v14 = vpop.permute.xlu2 %279 }
  0x7a   :  { %v110_v5 = vpop.permute.xlu0 %109  ;;  %v100_v6 = vpop.permute.xlu1 %99 }
  0x7b   :  { %v120_v12 = vmul.f32 %v573_v8, %v110_v5  ;;  %v118_v17 = vmul.f32 %v573_v8, %v100_v6  ;;  %v39_v6 = vld [vmem:[%s712_s0 + $0x10] sm:$0xf] }
  0x82   :  { %v115_v10 = vpop.permute.xlu0 %114  ;;  %v105_v11 = vpop.permute.xlu1 %104 }
  0x83   :  { %v121_v13 = vmul.f32 %v573_v8, %v115_v10  ;;  %v119_v15 = vmul.f32 %v573_v8, %v105_v11  ;;  %v562_v8 = vld [vmem:[#allocation2 + $0xb8] sm:$0xff]  ;;  %v560_v10 = vld [vmem:[#allocation2 + $0xa8] sm:$0xff]  ;;  %v559_v11 = vld [vmem:[#allocation2 + $0xa0] sm:$0xff] }
  0x85   :  { %v123_v16 = vpack.c.bf16 %v121_v13, %v120_v12  ;;  %v122_v19 = vpack.c.bf16 %v119_v15, %v118_v17  ;;  %v558_v12 = vld [vmem:[#allocation2 + $0x98] sm:$0xff]  ;;  %v557_v13 = vld [vmem:[#allocation2 + $0x90] sm:$0xff]  ;;  %v556_v15 = vld [vmem:[#allocation2 + $0x88] sm:$0xff] }
  0x87   :  { %148 = vmatpush.bf16.msra.mxu0 %v123_v16 }
  0x8b   :  { %149 = vmatpush.bf16.msra.mxu0 %v122_v19 }
  0x8e   :  { %436 = vmatmul.msk.bf16.vlgmr.msra.gmra.mxu0 %vm135_vm0, %v537_v20 }
  0x8f   :  { %333 = vmatpush.bf16.msrb.mxu0 %v554_v48 }
  0x93   :  { %334 = vmatpush.bf16.msrb.mxu0 %v553_v51 }
  0x97   :  { %335 = vmatpush.bf16.msrb.mxu0 %v552_v52 }
  0x9b   :  { %336 = vmatpush.bf16.msrb.mxu0 %v551_v54 }
  0x9e   :  { %437 = vmatmul.msk.bf16.gmra.mxu0 %vm135_vm0, %v538_v21 }
  0x9f   :  { %337 = vmatpush.bf16.msrb.mxu0 %v550_v55 }
  0xa3   :  { %338 = vmatpush.bf16.msrb.mxu0 %v549_v59 }
  0xa7   :  { %339 = vmatpush.bf16.msrb.mxu0 %v548_v1 }
  0xab   :  { %340 = vmatpush.bf16.msrb.mxu0 %v547_v7 }
 0x10b   :  { %v151_v26 = vpop.f32.mrf.mxu0 }
 0x10c   :  { %v152_v28 = vadd.f32 %v574_v27, %v151_v26 }
 0x10e   :  { %v161_v31 = vmax.f32 %v152_v28, 0.0 }
 0x113   :  { %v153_v29 = vpop.f32.mrf.mxu0 }
 0x114   :  { %v154_v30 = vadd.f32 %v574_v27, %v153_v29 }
 0x116   :  { %v162_v32 = vmax.f32 %v154_v30, 0.0 }
 0x118   :  { %v165_v33 = vpack.c.bf16 %v162_v32, %v161_v31 }
 0x11a   :  { %223 = vmatmul.bf16.vlgmr.msra.gmra.mxu1 %v165_v33 }
 0x11b   :  { %v156_v34 = vpop.f32.mrf.mxu0 }
 0x11c   :  { %v157_v35 = vadd.f32 %v574_v27, %v156_v34 }
 0x11e   :  { %v163_v38 = vmax.f32 %v157_v35, 0.0 }
 0x123   :  { %v158_v36 = vpop.f32.mrf.mxu0 }
 0x124   :  { %v159_v37 = vadd.f32 %v574_v27, %v158_v36  ;;  %v577_v27 = vld [vmem:[%s715_s3 + $0x4] ss:$0 sm:$0xff] }
 0x126   :  { %v164_v39 = vmax.f32 %v159_v37, 0.0 }
 0x128   :  { %v166_v40 = vpack.c.bf16 %v164_v39, %v163_v38 }
 0x12a   :  { %228 = vmatmul.bf16.gmra.mxu1 %v166_v40 }
 0x197   :  { %v224_v41 = vpop.f32.mrf.mxu1 }
 0x19f   :  { %v226_v42 = vpop.f32.mrf.mxu1 }
 0x1a0   :  { %v234_v46 = vpack.c.bf16 %v226_v42, %v224_v41 }
 0x1a7   :  { %v229_v43 = vpop.f32.mrf.mxu1 }
 0x1af   :  { %v231_v44 = vpop.f32.mrf.mxu1 }
 0x1b0   :  { %v235_v45 = vpack.c.bf16 %v231_v44, %v229_v43 }
 0x1b2   :  { %243 = vmatpush.bf16.msra.mxu2 %v235_v45 }
 0x1b6   :  { %244 = vmatpush.bf16.msra.mxu2 %v234_v46 }
 0x1b9   :  { %470 = vmatmul.msk.bf16.vlgmr.msra.gmra.mxu2 %vm135_vm0, %v537_v20  ;;  %v555_v20 = vld [vmem:[#allocation2 + $0x80] sm:$0xff] }
 0x1ba   :  { %397 = vmatpush.bf16.msrb.mxu2 %v562_v8 }
 0x1be   :  { %398 = vmatpush.bf16.msrb.mxu2 %v561_v9 }
 0x1c2   :  { %399 = vmatpush.bf16.msrb.mxu2 %v560_v10 }
 0x1c6   :  { %400 = vmatpush.bf16.msrb.mxu2 %v559_v11 }
 0x1c9   :  { %471 = vmatmul.msk.bf16.gmra.mxu2 %vm135_vm0, %v538_v21  ;;  %v576_v21 = vld [vmem:[%s715_s3 + $0x3] ss:$0 sm:$0xff] }
 0x1ca   :  { %401 = vmatpush.bf16.msrb.mxu2 %v558_v12 }
 0x1ce   :  { %402 = vmatpush.bf16.msrb.mxu2 %v557_v13 }
 0x1d2   :  { %403 = vmatpush.bf16.msrb.mxu2 %v556_v15 }
 0x1d6   :  { %404 = vmatpush.bf16.msrb.mxu2 %v555_v20 }
 0x23c   :  { %v246_v47 = vpop.f32.mrf.mxu2 }
 0x23d   :  { %v247_v62 = vadd.f32 %v575_v56, %v246_v47 }
 0x23f   :  { %v256_v4 = vmax.f32 %v247_v62, 0.0 }
 0x244   :  { %v248_v50 = vpop.f32.mrf.mxu2 }
 0x245   :  { %v249_v60 = vadd.f32 %v575_v56, %v248_v50 }
 0x247   :  { %v257_v2 = vmax.f32 %v249_v60, 0.0 }
 0x249   :  { %v260_v5 = vpack.c.bf16 %v257_v2, %v256_v4 }
 0x24c   :  { %v251_v53 = vpop.f32.mrf.mxu2 }
 0x24d   :  { %v252_v57 = vadd.f32 %v575_v56, %v251_v53 }
 0x24f   :  { %v258_v63 = vmax.f32 %v252_v57, 0.0 }
 0x254   :  { %v253_v58 = vpop.f32.mrf.mxu2 }
 0x255   :  { %v254_v61 = vadd.f32 %v575_v56, %v253_v58 }
 0x257   :  { %v259_v0 = vmax.f32 %v254_v61, 0.0 }
 0x259   :  { %v261_v3 = vpack.c.bf16 %v259_v0, %v258_v63 }
 0x25b   :  { %271 = vmatpush.bf16.msra.mxu3 %v261_v3 }
 0x25f   :  { %272 = vmatpush.bf16.msra.mxu3 %v260_v5 }
 0x262   :  { %472 = vmatmul.msk.bf16.vlgmr.msra.gmra.mxu3 %vm135_vm0, %v39_v6 }
 0x2e5   :  { %v274_v16 = vpop.f32.mrf.mxu3 }
 0x2e6   :  { %v282_v17 = vmul.f32 %v280_v14, %v274_v16 }
 0x2e8   :  { %v283_v18 = vpack.c.bf16 %v282_v17, %v282_v17 }
 0x2ea   :  { %341 = vmatmul.bf16.vlgmr.msrb.gmra.mxu0 %v283_v18 }
 0x2ed   :  { %v276_v19 = vpop.f32.mrf.mxu3 }
 0x367   :  { %v342_v22 = vpop.f32.mrf.mxu0 }
 0x368   :  { %v343_v23 = vadd.f32 %v576_v21, %v342_v22 }
 0x36a   :  { %v346_v24 = vmax.f32 %v343_v23, 0.0 }
 0x36c   :  { %v347_v25 = vpack.c.bf16 %v346_v24, %v346_v24 }
 0x36e   :  { %405 = vmatmul.bf16.vlgmr.msrb.gmra.mxu2 %v347_v25 }
 0x36f   :  { %v344_v26 = vpop.f32.mrf.mxu0 }
 0x3f1   :  { %v406_v28 = vpop.f32.mrf.mxu2 }
 0x3f2   :  { %v407_v29 = vadd.f32 %v577_v27, %v406_v28 }
 0x3f4   :  { %410 = vst [vmem:[#allocation5] sm:$0xff] %v407_v29 }
 0x3f5   :  { %421 = dma.vmem_to_hbm [thread:$0]  %s417_s18, 128, %s419_s21, [#allocation4]  }
 0x3f9   :  { %v408_v30 = vpop.f32.mrf.mxu2 }
 0x3fa   :  { %628 = dma.done.wait [#allocation4], 128  }
 0x3fb   :  { %629 = vsyncadd [#allocation4], 4294967168 }
 0x3fc   :  { %426 = vsyncpa [#allocation3], 1 }
 0x3fd   :  { %427 = vsyncpa [#allocation4], 1 }

</bundles_post_ra>
